<compile_context>
chip_gen: v5e
topology: v5e:2x2
jax: 0.10.0
libtpu: 0.0.40
codegen_flags: <defaults>
</compile_context>

<pallas_src>
import functools

import jax
import jax.numpy as jnp
from jax import lax
from jax.experimental import pallas as pl
from jax.experimental.pallas import tpu as pltpu

K = 3        # kernel size
S = 2        # stride
P = K // 2   # padding
LANE = 128


def _round_up(x, m):
    return (x + m - 1) // m * m


def _phase_split_nchw(x):
    """(N, C, Hp, Wp) with even Hp, Wp -> (N, 4, Hp//2, Wp//2, C); phase = 2*(h%2)+(w%2)."""
    n, c, hp, wp = x.shape
    x = x.reshape(n, c, hp // 2, 2, wp // 2, 2)
    x = jnp.transpose(x, (0, 3, 5, 2, 4, 1))
    return x.reshape(n, 4, hp // 2, wp // 2, c)


def _pick_row_tile(ho, wo, target_rows):
    """Rows-per-tile tho with tho*wo near target; prefer multiples of 256 (MXU M),
    then 8 (sublanes).  Never silently falls back to the whole image: the grid is
    cdiv-based and the (padded) last tile is sliced off by the wrapper."""
    cap = max(1, min(ho, target_rows // max(1, wo)))
    for align in (256, 8):
        for tho in range(cap, 0, -1):
            if (tho * wo) % align == 0:
                return tho
    return cap


def _block_encode_kernel(x_ref, w_ref, p_ref, out_ref, *, tho, wo, cin1, cout, cout_p):
    """One (batch, output-row-tile) per grid step.

    x_ref  : (1, 1, 4, tho+1, wp2, cin1) halo row tile of the phase-split, padded,
             pre-masked image with the raw mask folded in as channel cin (bf16)
    w_ref  : (9, cin1, cout_p) per-tap augmented weights: [:, :cin, :cout] = conv
             taps, [:, cin, cout] = 1 -> mask-sum accumulates into lane `cout` (bf16)
    p_ref  : (3, cout_p)  [bias, folded-BN scale, folded-BN shift] (f32)
    out_ref: (1, 1, tho*wo, cout_p) lanes [0:cout] = conv out, lane cout = mask (bf16)
    """
    rows = tho * wo

    # Per-tap accumulating matmuls: bounds the live set to ~one lane-sparse tap
    # plus the f32 accumulator (no 18-way lane concat / vreg spills).
    acc = None
    for kh in range(K):
        for kw in range(K):
            ph = 2 * (kh % 2) + (kw % 2)
            hs, ws = kh // 2, kw // 2
            tap = x_ref[0, 0, ph, pl.ds(hs, tho), pl.ds(ws, wo), :]    # (tho, wo, cin1)
            tap = tap.reshape(rows, cin1)
            contrib = jnp.dot(tap, w_ref[3 * kh + kw],
                              preferred_element_type=jnp.float32)      # (rows, cout_p)
            acc = contrib if acc is None else acc + contrib

    msum = acc[:, cout:cout + 1]                  # (rows, 1), exact integer tap count
    update = jnp.clip(msum, 0.0, 1.0)
    ratio = float(K * K) * pl.reciprocal(msum + 1e-8, approx=True) * update

    bias = p_ref[0:1, :]
    scale = p_ref[1:2, :]
    shift = p_ref[2:3, :]
    out = (acc * ratio + bias) * update           # NVIDIA partial-conv renormalization
    out = out * scale + shift                     # folded eval-mode BatchNorm
    out = jnp.maximum(out, 0.0)                   # ReLU

    # Hoisted (1, cout_p) lane predicate -> single broadcast select writes the
    # updated mask into spare lane `cout`; one dense bf16 slab store.
    lane = lax.broadcasted_iota(jnp.int32, (1, cout_p), 1)
    out = jnp.where(lane == cout, update, out)
    out_ref[0, 0] = out.astype(out_ref.dtype)


def block_encode_forward(img_nchw, mask_nchw, weight_oihw, bias, bn_params,
                         *, use_bn=True, row_tile_rows=1024):
    """Block(encoding=True).forward(img, mask) -> (pconv_o NCHW f32, mask_o N1HW f32)."""
    n, cin, h, w = img_nchw.shape
    cout = weight_oihw.shape[0]
    assert h % 2 == 0 and w % 2 == 0, "even spatial dims required for stride-2 phase split"
    ho, wo = h // 2, w // 2
    cin1 = cin + 1
    cout_p = _round_up(cout + 1, LANE)            # +1 spare lane carries the updated mask

    # Layout glue (fused by XLA into one pass per tensor): pre-mask the image, fold
    # the mask in as an extra channel, cast bf16, pad, phase-split from NCHW.
    x = jnp.concatenate([img_nchw * mask_nchw, mask_nchw], axis=1).astype(jnp.bfloat16)
    x = jnp.pad(x, ((0, 0), (0, 0), (P, P), (P, P)))
    xp = _phase_split_nchw(x)                     # (n, 4, hp2, wp2, cin1) bf16
    hp2, wp2 = xp.shape[2], xp.shape[3]

    tho = _pick_row_tile(ho, wo, row_tile_rows)
    nt = -(-ho // tho)                            # cdiv grid; padded last tile sliced off
    ho_pad = nt * tho
    if ho_pad + 1 > hp2:
        xp = jnp.pad(xp, ((0, 0), (0, 0), (0, ho_pad + 1 - hp2), (0, 0), (0, 0)))

    # Pre-materialize overlapping (tho+1)-row halo tiles in HBM so the kernel's
    # input BlockSpec indexes on the row-tile axis (streaming, bounded VMEM).
    row_idx = jnp.arange(nt)[:, None] * tho + jnp.arange(tho + 1)[None, :]
    tiles = jnp.take(xp, row_idx, axis=2)                    # (n, 4, nt, tho+1, wp2, cin1)
    tiles = jnp.transpose(tiles, (0, 2, 1, 3, 4, 5))         # (n, nt, 4, tho+1, wp2, cin1)

    # Per-tap augmented weights: conv taps + ones-entry routing the mask channel
    # into spare lane `cout` (mask-sum from the same matmuls).
    w_t = jnp.transpose(weight_oihw, (2, 3, 1, 0)).reshape(K * K, cin, cout)
    w_aug = jnp.zeros((K * K, cin1, cout_p), jnp.float32)
    w_aug = w_aug.at[:, :cin, :cout].set(w_t.astype(jnp.float32))
    w_aug = w_aug.at[:, cin, cout].set(1.0)
    w_aug = w_aug.astype(jnp.bfloat16)                       # (9, cin1, cout_p)

    # Bias + eval-mode BatchNorm folded into per-channel (bias, scale, shift).
    bias_p = jnp.pad(bias.astype(jnp.float32), (0, cout_p - cout))
    if use_bn:
        gamma = bn_params[0].astype(jnp.float32)
        beta = bn_params[1].astype(jnp.float32)
        mean = bn_params[2].astype(jnp.float32)
        var = bn_params[3].astype(jnp.float32)
        scale = gamma * lax.rsqrt(var + 1e-5)
        shift = beta - mean * scale
    else:
        scale = jnp.ones((cout,), jnp.float32)
        shift = jnp.zeros((cout,), jnp.float32)
    scale_p = jnp.pad(scale, (0, cout_p - cout), constant_values=1.0)
    shift_p = jnp.pad(shift, (0, cout_p - cout))
    params = jnp.stack([bias_p, scale_p, shift_p])           # (3, cout_p) f32

    rows = tho * wo
    kernel = functools.partial(_block_encode_kernel, tho=tho, wo=wo,
                               cin1=cin1, cout=cout, cout_p=cout_p)

    fused = pl.pallas_call(
        kernel,
        out_shape=jax.ShapeDtypeStruct((n, nt, rows, cout_p), jnp.bfloat16),
        grid_spec=pltpu.PrefetchScalarGridSpec(
            num_scalar_prefetch=0,
            grid=(n, nt),
            in_specs=[
                # Streamed halo tile: indexes on (batch, row-tile).
                pl.BlockSpec((1, 1, 4, tho + 1, wp2, cin1),
                             lambda i, t: (i, t, 0, 0, 0, 0)),
                # Constant index_maps -> weights/params stay VMEM-resident.
                pl.BlockSpec((K * K, cin1, cout_p), lambda i, t: (0, 0, 0)),
                pl.BlockSpec((3, cout_p), lambda i, t: (0, 0)),
            ],
            out_specs=pl.BlockSpec((1, 1, rows, cout_p), lambda i, t: (i, t, 0, 0)),
        ),
        compiler_params=pltpu.CompilerParams(
            dimension_semantics=("parallel", "parallel"),
            # Halo tiling keeps the true working set tiny; 32 MiB is safe even on
            # v7x's 64 MiB VMEM and leaves headroom for Mosaic internal scratch.
            vmem_limit_bytes=32 * 1024 * 1024),
    )(tiles, w_aug, params)

    fused = fused.reshape(n, ho_pad, wo, cout_p)[:, :ho]     # drop padded output rows
    pconv_o = jnp.transpose(fused[..., :cout], (0, 3, 1, 2)).astype(jnp.float32)
    mask_o = jnp.transpose(fused[..., cout:cout + 1], (0, 3, 1, 2)).astype(jnp.float32)
    return pconv_o, mask_o


def _reference(img, mask, weight, bias, bn, use_bn=True):
    """Pure-JAX reference of the same forward (for sanity checking)."""
    dn = ('NCHW', 'OIHW', 'NCHW')
    raw = lax.conv_general_dilated(img * mask, weight, (S, S),
                                   ((P, P), (P, P)), dimension_numbers=dn)
    ones_k = jnp.ones((1, 1, K, K), jnp.float32)
    msum = lax.conv_general_dilated(mask, ones_k, (S, S),
                                    ((P, P), (P, P)), dimension_numbers=dn)
    update_mask = jnp.clip(msum, 0.0, 1.0)
    mask_ratio = (float(K * K) / (msum + 1e-8)) * update_mask
    out = (raw * mask_ratio + bias.reshape(1, -1, 1, 1)) * update_mask
    if use_bn:
        gamma, beta, mean, var = [p.reshape(1, -1, 1, 1) for p in bn]
        out = (out - mean) * (gamma * lax.rsqrt(var + 1e-5)) + beta
    out = jnp.maximum(out, 0.0)
    return out, update_mask


if __name__ == "__main__":
    key = jax.random.PRNGKey(0)
    ks = jax.random.split(key, 8)
    N, CIN, H, W = 2, 4, 16, 16
    COUT = 8

    # Inputs: image (NCHW) and single-channel binary validity mask (N,1,H,W).
    img = jax.random.normal(ks[0], (N, CIN, H, W), jnp.float32)
    mask = (jax.random.uniform(ks[1], (N, 1, H, W)) > 0.25).astype(jnp.float32)

    # Deterministic parameter init (shapes from Block(CIN, COUT, encoding=True)).
    weight = 0.1 * jax.random.normal(ks[2], (COUT, CIN, K, K), jnp.float32)  # Conv2d weight
    bias = 0.1 * jax.random.normal(ks[3], (COUT,), jnp.float32)              # Conv2d bias
    gamma = 1.0 + 0.1 * jax.random.normal(ks[4], (COUT,), jnp.float32)       # BN weight
    beta = 0.1 * jax.random.normal(ks[5], (COUT,), jnp.float32)              # BN bias
    r_mean = 0.1 * jax.random.normal(ks[6], (COUT,), jnp.float32)            # BN running_mean
    r_var = 1.0 + 0.1 * jnp.abs(jax.random.normal(ks[7], (COUT,), jnp.float32))  # BN running_var
    bn = jnp.stack([gamma, beta, r_mean, r_var])   # (4, COUT)

    # row_tile_rows=24 -> tho=3, cdiv grid nt=3 with a padded last tile
    # (exercises the streamed halo-tile grid axis and the padded-tail path).
    pconv_o, mask_o = block_encode_forward(img, mask, weight, bias, bn,
                                           use_bn=True, row_tile_rows=24)
    jax.block_until_ready((pconv_o, mask_o))

    ref_o, ref_m = _reference(img, mask, weight, bias, bn, use_bn=True)
    assert pconv_o.shape == (N, COUT, H // 2, W // 2)
    assert mask_o.shape == (N, 1, H // 2, W // 2)
    assert jnp.allclose(pconv_o, ref_o, atol=5e-2, rtol=5e-2)   # bf16 operands/output
    assert jnp.allclose(mask_o, ref_m, atol=1e-5)               # mask path is exact
    print("KERNEL_OK")
</pallas_src>

<mosaic_0001>
module attributes {stable_mosaic.version = 11 : i64} {
  func.func @_block_encode_kernel(%arg0: i32, %arg1: i32, %arg2: memref<1x1x4x4x9x5xbf16, #tpu.memory_space<vmem>>, %arg3: memref<9x5x128xbf16, #tpu.memory_space<vmem>>, %arg4: memref<3x128xf32, #tpu.memory_space<vmem>>, %arg5: memref<1x1x24x128xbf16, #tpu.memory_space<vmem>>) attributes {dimension_semantics = [#tpu.dimension_semantics<parallel>, #tpu.dimension_semantics<parallel>], iteration_bounds = array<i64: 2, 3>, scalar_prefetch = 0 : i64, scratch_operands = 0 : i64, tpu.core_type = #tpu.core_type<tc>, window_params = [{transform_indices = @transform_0, window_bounds = array<i64: 1, 1, 4, 4, 9, 5>}, {pipeline_mode = #tpu.pipeline_mode<synchronous>, transform_indices = @transform_1, window_bounds = array<i64: 9, 5, 128>}, {pipeline_mode = #tpu.pipeline_mode<synchronous>, transform_indices = @transform_2, window_bounds = array<i64: 3, 128>}, {transform_indices = @transform_3, window_bounds = array<i64: 1, 1, 24, 128>}]} {
    %c0 = arith.constant 0 : index
    %c0_0 = arith.constant 0 : index
    %c0_1 = arith.constant 0 : index
    %c0_2 = arith.constant 0 : index
    %c0_3 = arith.constant 0 : index
    %c0_4 = arith.constant 0 : index
    %0 = vector.load %arg2[%c0, %c0_0, %c0_1, %c0_2, %c0_3, %c0_4] : memref<1x1x4x4x9x5xbf16, #tpu.memory_space<vmem>>, vector<1x1x1x3x8x5xbf16>
    %1 = vector.shape_cast %0 : vector<1x1x1x3x8x5xbf16> to vector<3x8x5xbf16>
    %2 = vector.shape_cast %1 : vector<3x8x5xbf16> to vector<24x5xbf16>
    %c0_5 = arith.constant 0 : index
    %c0_6 = arith.constant 0 : index
    %c0_7 = arith.constant 0 : index
    %3 = vector.load %arg3[%c0_5, %c0_6, %c0_7] : memref<9x5x128xbf16, #tpu.memory_space<vmem>>, vector<1x5x128xbf16>
    %4 = vector.shape_cast %3 : vector<1x5x128xbf16> to vector<5x128xbf16>
    %cst = arith.constant dense<0.000000e+00> : vector<24x128xf32>
    %5 = tpu.matmul %2, %4, %cst {dimension_numbers = #tpu.dot_dimension_numbers<[1], [0], [0], [1], [0, 0, 1, 1], [], []>} : vector<24x5xbf16>, vector<5x128xbf16>, vector<24x128xf32> -> vector<24x128xf32>
    %c0_8 = arith.constant 0 : index
    %c0_9 = arith.constant 0 : index
    %c1 = arith.constant 1 : index
    %c0_10 = arith.constant 0 : index
    %c0_11 = arith.constant 0 : index
    %c0_12 = arith.constant 0 : index
    %6 = vector.load %arg2[%c0_8, %c0_9, %c1, %c0_10, %c0_11, %c0_12] : memref<1x1x4x4x9x5xbf16, #tpu.memory_space<vmem>>, vector<1x1x1x3x8x5xbf16>
    %7 = vector.shape_cast %6 : vector<1x1x1x3x8x5xbf16> to vector<3x8x5xbf16>
    %8 = vector.shape_cast %7 : vector<3x8x5xbf16> to vector<24x5xbf16>
    %c1_13 = arith.constant 1 : index
    %c0_14 = arith.constant 0 : index
    %c0_15 = arith.constant 0 : index
    %9 = vector.load %arg3[%c1_13, %c0_14, %c0_15] : memref<9x5x128xbf16, #tpu.memory_space<vmem>>, vector<1x5x128xbf16>
    %10 = vector.shape_cast %9 : vector<1x5x128xbf16> to vector<5x128xbf16>
    %cst_16 = arith.constant dense<0.000000e+00> : vector<24x128xf32>
    %11 = tpu.matmul %8, %10, %cst_16 {dimension_numbers = #tpu.dot_dimension_numbers<[1], [0], [0], [1], [0, 0, 1, 1], [], []>} : vector<24x5xbf16>, vector<5x128xbf16>, vector<24x128xf32> -> vector<24x128xf32>
    %12 = arith.addf %5, %11 : vector<24x128xf32>
    %c0_17 = arith.constant 0 : index
    %c0_18 = arith.constant 0 : index
    %c0_19 = arith.constant 0 : index
    %c0_20 = arith.constant 0 : index
    %c1_21 = arith.constant 1 : index
    %c0_22 = arith.constant 0 : index
    %13 = vector.load %arg2[%c0_17, %c0_18, %c0_19, %c0_20, %c1_21, %c0_22] : memref<1x1x4x4x9x5xbf16, #tpu.memory_space<vmem>>, vector<1x1x1x3x8x5xbf16>
    %14 = vector.shape_cast %13 : vector<1x1x1x3x8x5xbf16> to vector<3x8x5xbf16>
    %15 = vector.shape_cast %14 : vector<3x8x5xbf16> to vector<24x5xbf16>
    %c2 = arith.constant 2 : index
    %c0_23 = arith.constant 0 : index
    %c0_24 = arith.constant 0 : index
    %16 = vector.load %arg3[%c2, %c0_23, %c0_24] : memref<9x5x128xbf16, #tpu.memory_space<vmem>>, vector<1x5x128xbf16>
    %17 = vector.shape_cast %16 : vector<1x5x128xbf16> to vector<5x128xbf16>
    %cst_25 = arith.constant dense<0.000000e+00> : vector<24x128xf32>
    %18 = tpu.matmul %15, %17, %cst_25 {dimension_numbers = #tpu.dot_dimension_numbers<[1], [0], [0], [1], [0, 0, 1, 1], [], []>} : vector<24x5xbf16>, vector<5x128xbf16>, vector<24x128xf32> -> vector<24x128xf32>
    %19 = arith.addf %12, %18 : vector<24x128xf32>
    %c0_26 = arith.constant 0 : index
    %c0_27 = arith.constant 0 : index
    %c2_28 = arith.constant 2 : index
    %c0_29 = arith.constant 0 : index
    %c0_30 = arith.constant 0 : index
    %c0_31 = arith.constant 0 : index
    %20 = vector.load %arg2[%c0_26, %c0_27, %c2_28, %c0_29, %c0_30, %c0_31] : memref<1x1x4x4x9x5xbf16, #tpu.memory_space<vmem>>, vector<1x1x1x3x8x5xbf16>
    %21 = vector.shape_cast %20 : vector<1x1x1x3x8x5xbf16> to vector<3x8x5xbf16>
    %22 = vector.shape_cast %21 : vector<3x8x5xbf16> to vector<24x5xbf16>
    %c3 = arith.constant 3 : index
    %c0_32 = arith.constant 0 : index
    %c0_33 = arith.constant 0 : index
    %23 = vector.load %arg3[%c3, %c0_32, %c0_33] : memref<9x5x128xbf16, #tpu.memory_space<vmem>>, vector<1x5x128xbf16>
    %24 = vector.shape_cast %23 : vector<1x5x128xbf16> to vector<5x128xbf16>
    %cst_34 = arith.constant dense<0.000000e+00> : vector<24x128xf32>
    %25 = tpu.matmul %22, %24, %cst_34 {dimension_numbers = #tpu.dot_dimension_numbers<[1], [0], [0], [1], [0, 0, 1, 1], [], []>} : vector<24x5xbf16>, vector<5x128xbf16>, vector<24x128xf32> -> vector<24x128xf32>
    %26 = arith.addf %19, %25 : vector<24x128xf32>
    %c0_35 = arith.constant 0 : index
    %c0_36 = arith.constant 0 : index
    %c3_37 = arith.constant 3 : index
    %c0_38 = arith.constant 0 : index
    %c0_39 = arith.constant 0 : index
    %c0_40 = arith.constant 0 : index
    %27 = vector.load %arg2[%c0_35, %c0_36, %c3_37, %c0_38, %c0_39, %c0_40] : memref<1x1x4x4x9x5xbf16, #tpu.memory_space<vmem>>, vector<1x1x1x3x8x5xbf16>
    %28 = vector.shape_cast %27 : vector<1x1x1x3x8x5xbf16> to vector<3x8x5xbf16>
    %29 = vector.shape_cast %28 : vector<3x8x5xbf16> to vector<24x5xbf16>
    %c4 = arith.constant 4 : index
    %c0_41 = arith.constant 0 : index
    %c0_42 = arith.constant 0 : index
    %30 = vector.load %arg3[%c4, %c0_41, %c0_42] : memref<9x5x128xbf16, #tpu.memory_space<vmem>>, vector<1x5x128xbf16>
    %31 = vector.shape_cast %30 : vector<1x5x128xbf16> to vector<5x128xbf16>
    %cst_43 = arith.constant dense<0.000000e+00> : vector<24x128xf32>
    %32 = tpu.matmul %29, %31, %cst_43 {dimension_numbers = #tpu.dot_dimension_numbers<[1], [0], [0], [1], [0, 0, 1, 1], [], []>} : vector<24x5xbf16>, vector<5x128xbf16>, vector<24x128xf32> -> vector<24x128xf32>
    %33 = arith.addf %26, %32 : vector<24x128xf32>
    %c0_44 = arith.constant 0 : index
    %c0_45 = arith.constant 0 : index
    %c2_46 = arith.constant 2 : index
    %c0_47 = arith.constant 0 : index
    %c1_48 = arith.constant 1 : index
    %c0_49 = arith.constant 0 : index
    %34 = vector.load %arg2[%c0_44, %c0_45, %c2_46, %c0_47, %c1_48, %c0_49] : memref<1x1x4x4x9x5xbf16, #tpu.memory_space<vmem>>, vector<1x1x1x3x8x5xbf16>
    %35 = vector.shape_cast %34 : vector<1x1x1x3x8x5xbf16> to vector<3x8x5xbf16>
    %36 = vector.shape_cast %35 : vector<3x8x5xbf16> to vector<24x5xbf16>
    %c5 = arith.constant 5 : index
    %c0_50 = arith.constant 0 : index
    %c0_51 = arith.constant 0 : index
    %37 = vector.load %arg3[%c5, %c0_50, %c0_51] : memref<9x5x128xbf16, #tpu.memory_space<vmem>>, vector<1x5x128xbf16>
    %38 = vector.shape_cast %37 : vector<1x5x128xbf16> to vector<5x128xbf16>
    %cst_52 = arith.constant dense<0.000000e+00> : vector<24x128xf32>
    %39 = tpu.matmul %36, %38, %cst_52 {dimension_numbers = #tpu.dot_dimension_numbers<[1], [0], [0], [1], [0, 0, 1, 1], [], []>} : vector<24x5xbf16>, vector<5x128xbf16>, vector<24x128xf32> -> vector<24x128xf32>
    %40 = arith.addf %33, %39 : vector<24x128xf32>
    %c0_53 = arith.constant 0 : index
    %c0_54 = arith.constant 0 : index
    %c0_55 = arith.constant 0 : index
    %c1_56 = arith.constant 1 : index
    %c0_57 = arith.constant 0 : index
    %c0_58 = arith.constant 0 : index
    %41 = vector.load %arg2[%c0_53, %c0_54, %c0_55, %c1_56, %c0_57, %c0_58] : memref<1x1x4x4x9x5xbf16, #tpu.memory_space<vmem>>, vector<1x1x1x3x8x5xbf16>
    %42 = vector.shape_cast %41 : vector<1x1x1x3x8x5xbf16> to vector<3x8x5xbf16>
    %43 = vector.shape_cast %42 : vector<3x8x5xbf16> to vector<24x5xbf16>
    %c6 = arith.constant 6 : index
    %c0_59 = arith.constant 0 : index
    %c0_60 = arith.constant 0 : index
    %44 = vector.load %arg3[%c6, %c0_59, %c0_60] : memref<9x5x128xbf16, #tpu.memory_space<vmem>>, vector<1x5x128xbf16>
    %45 = vector.shape_cast %44 : vector<1x5x128xbf16> to vector<5x128xbf16>
    %cst_61 = arith.constant dense<0.000000e+00> : vector<24x128xf32>
    %46 = tpu.matmul %43, %45, %cst_61 {dimension_numbers = #tpu.dot_dimension_numbers<[1], [0], [0], [1], [0, 0, 1, 1], [], []>} : vector<24x5xbf16>, vector<5x128xbf16>, vector<24x128xf32> -> vector<24x128xf32>
    %47 = arith.addf %40, %46 : vector<24x128xf32>
    %c0_62 = arith.constant 0 : index
    %c0_63 = arith.constant 0 : index
    %c1_64 = arith.constant 1 : index
    %c1_65 = arith.constant 1 : index
    %c0_66 = arith.constant 0 : index
    %c0_67 = arith.constant 0 : index
    %48 = vector.load %arg2[%c0_62, %c0_63, %c1_64, %c1_65, %c0_66, %c0_67] : memref<1x1x4x4x9x5xbf16, #tpu.memory_space<vmem>>, vector<1x1x1x3x8x5xbf16>
    %49 = vector.shape_cast %48 : vector<1x1x1x3x8x5xbf16> to vector<3x8x5xbf16>
    %50 = vector.shape_cast %49 : vector<3x8x5xbf16> to vector<24x5xbf16>
    %c7 = arith.constant 7 : index
    %c0_68 = arith.constant 0 : index
    %c0_69 = arith.constant 0 : index
    %51 = vector.load %arg3[%c7, %c0_68, %c0_69] : memref<9x5x128xbf16, #tpu.memory_space<vmem>>, vector<1x5x128xbf16>
    %52 = vector.shape_cast %51 : vector<1x5x128xbf16> to vector<5x128xbf16>
    %cst_70 = arith.constant dense<0.000000e+00> : vector<24x128xf32>
    %53 = tpu.matmul %50, %52, %cst_70 {dimension_numbers = #tpu.dot_dimension_numbers<[1], [0], [0], [1], [0, 0, 1, 1], [], []>} : vector<24x5xbf16>, vector<5x128xbf16>, vector<24x128xf32> -> vector<24x128xf32>
    %54 = arith.addf %47, %53 : vector<24x128xf32>
    %c0_71 = arith.constant 0 : index
    %c0_72 = arith.constant 0 : index
    %c0_73 = arith.constant 0 : index
    %c1_74 = arith.constant 1 : index
    %c1_75 = arith.constant 1 : index
    %c0_76 = arith.constant 0 : index
    %55 = vector.load %arg2[%c0_71, %c0_72, %c0_73, %c1_74, %c1_75, %c0_76] : memref<1x1x4x4x9x5xbf16, #tpu.memory_space<vmem>>, vector<1x1x1x3x8x5xbf16>
    %56 = vector.shape_cast %55 : vector<1x1x1x3x8x5xbf16> to vector<3x8x5xbf16>
    %57 = vector.shape_cast %56 : vector<3x8x5xbf16> to vector<24x5xbf16>
    %c8 = arith.constant 8 : index
    %c0_77 = arith.constant 0 : index
    %c0_78 = arith.constant 0 : index
    %58 = vector.load %arg3[%c8, %c0_77, %c0_78] : memref<9x5x128xbf16, #tpu.memory_space<vmem>>, vector<1x5x128xbf16>
    %59 = vector.shape_cast %58 : vector<1x5x128xbf16> to vector<5x128xbf16>
    %cst_79 = arith.constant dense<0.000000e+00> : vector<24x128xf32>
    %60 = tpu.matmul %57, %59, %cst_79 {dimension_numbers = #tpu.dot_dimension_numbers<[1], [0], [0], [1], [0, 0, 1, 1], [], []>} : vector<24x5xbf16>, vector<5x128xbf16>, vector<24x128xf32> -> vector<24x128xf32>
    %61 = arith.addf %54, %60 : vector<24x128xf32>
    %62 = vector.extract_strided_slice %61 {offsets = [0, 8], sizes = [24, 1], strides = [1, 1]} : vector<24x128xf32> to vector<24x1xf32>
    %cst_80 = arith.constant 0.000000e+00 : f32
    %cst_81 = arith.constant 1.000000e+00 : f32
    %63 = vector.broadcast %cst_80 : f32 to vector<24x1xf32>
    %64 = arith.maximumf %63, %62 : vector<24x1xf32>
    %65 = vector.broadcast %cst_81 : f32 to vector<24x1xf32>
    %66 = arith.minimumf %65, %64 : vector<24x1xf32>
    %cst_82 = arith.constant 9.99999993E-9 : f32
    %67 = vector.broadcast %cst_82 : f32 to vector<24x1xf32>
    %68 = arith.addf %62, %67 : vector<24x1xf32>
    %69 = tpu.reciprocal %68 {approx = true} : vector<24x1xf32> -> vector<24x1xf32>
    %cst_83 = arith.constant 9.000000e+00 : f32
    %70 = vector.broadcast %cst_83 : f32 to vector<24x1xf32>
    %71 = arith.mulf %70, %69 : vector<24x1xf32>
    %72 = arith.mulf %71, %66 : vector<24x1xf32>
    %c0_84 = arith.constant 0 : index
    %c0_85 = arith.constant 0 : index
    %73 = vector.load %arg4[%c0_84, %c0_85] : memref<3x128xf32, #tpu.memory_space<vmem>>, vector<1x128xf32>
    %c1_86 = arith.constant 1 : index
    %c0_87 = arith.constant 0 : index
    %74 = vector.load %arg4[%c1_86, %c0_87] : memref<3x128xf32, #tpu.memory_space<vmem>>, vector<1x128xf32>
    %c2_88 = arith.constant 2 : index
    %c0_89 = arith.constant 0 : index
    %75 = vector.load %arg4[%c2_88, %c0_89] : memref<3x128xf32, #tpu.memory_space<vmem>>, vector<1x128xf32>
    %76 = vector.broadcast %72 : vector<24x1xf32> to vector<24x128xf32>
    %77 = arith.mulf %61, %76 : vector<24x128xf32>
    %78 = vector.broadcast %73 : vector<1x128xf32> to vector<24x128xf32>
    %79 = arith.addf %77, %78 : vector<24x128xf32>
    %80 = vector.broadcast %66 : vector<24x1xf32> to vector<24x128xf32>
    %81 = arith.mulf %79, %80 : vector<24x128xf32>
    %82 = vector.broadcast %74 : vector<1x128xf32> to vector<24x128xf32>
    %83 = arith.mulf %81, %82 : vector<24x128xf32>
    %84 = vector.broadcast %75 : vector<1x128xf32> to vector<24x128xf32>
    %85 = arith.addf %83, %84 : vector<24x128xf32>
    %cst_90 = arith.constant 0.000000e+00 : f32
    %86 = vector.broadcast %cst_90 : f32 to vector<24x128xf32>
    %87 = arith.maximumf %85, %86 : vector<24x128xf32>
    %88 = tpu.iota {dimensions = array<i32: 1>} : vector<1x128xi32>
    %c8_i32 = arith.constant 8 : i32
    %89 = vector.broadcast %c8_i32 : i32 to vector<1x128xi32>
    %90 = arith.cmpi eq, %88, %89 : vector<1x128xi32>
    %91 = vector.shape_cast %90 : vector<1x128xi1> to vector<1x128xi1>
    %92 = vector.broadcast %91 : vector<1x128xi1> to vector<24x128xi1>
    %93 = vector.shape_cast %66 : vector<24x1xf32> to vector<24x1xf32>
    %94 = vector.broadcast %93 : vector<24x1xf32> to vector<24x128xf32>
    %95 = arith.select %92, %94, %87 : vector<24x128xi1>, vector<24x128xf32>
    %96 = arith.truncf %95 : vector<24x128xf32> to vector<24x128xbf16>
    %c0_91 = arith.constant 0 : index
    %c0_92 = arith.constant 0 : index
    %c0_93 = arith.constant 0 : index
    %c0_94 = arith.constant 0 : index
    %97 = vector.load %arg5[%c0_91, %c0_92, %c0_93, %c0_94] : memref<1x1x24x128xbf16, #tpu.memory_space<vmem>>, vector<1x1x24x128xbf16>
    %98 = vector.shape_cast %97 : vector<1x1x24x128xbf16> to vector<24x128xbf16>
    %99 = vector.shape_cast %96 : vector<24x128xbf16> to vector<1x1x24x128xbf16>
    tpu.vector_store %arg5[%c0_91, %c0_92, %c0_93, %c0_94], %99 {strides = array<i32>} : memref<1x1x24x128xbf16, #tpu.memory_space<vmem>>, vector<1x1x24x128xbf16>,
    return
  }
  func.func @transform_0(%arg0: i32, %arg1: i32) -> (i32, i32, i32, i32, i32, i32) {
    %c0_i32 = arith.constant 0 : i32
    %c0_i32_0 = arith.constant 0 : i32
    %c0_i32_1 = arith.constant 0 : i32
    %c0_i32_2 = arith.constant 0 : i32
    %c0_i32_3 = arith.constant 0 : i32
    return %arg0, %arg1, %c0_i32, %c0_i32_0, %c0_i32_1, %c0_i32_2 : i32, i32, i32, i32, i32, i32
  }
  func.func @transform_1(%arg0: i32, %arg1: i32) -> (i32, i32, i32) {
    %c0_i32 = arith.constant 0 : i32
    %c0_i32_0 = arith.constant 0 : i32
    %c0_i32_1 = arith.constant 0 : i32
    %c0_i32_2 = arith.constant 0 : i32
    return %c0_i32, %c0_i32_0, %c0_i32_1 : i32, i32, i32
  }
  func.func @transform_2(%arg0: i32, %arg1: i32) -> (i32, i32) {
    %c0_i32 = arith.constant 0 : i32
    %c0_i32_0 = arith.constant 0 : i32
    %c0_i32_1 = arith.constant 0 : i32
    return %c0_i32, %c0_i32_0 : i32, i32
  }
  func.func @transform_3(%arg0: i32, %arg1: i32) -> (i32, i32, i32, i32) {
    %c0_i32 = arith.constant 0 : i32
    %c0_i32_0 = arith.constant 0 : i32
    %c0_i32_1 = arith.constant 0 : i32
    return %arg0, %arg1, %c0_i32, %c0_i32_0 : i32, i32, i32, i32
  }
}

</mosaic_0001>

<bundles_post_ra>
// kernel: tpu_custom_call.1
= control target key start
LH: loop header
LB: loop body
LE: loop exit
PB: predicated region body
PF: predicated region fallthrough
CT: control target
= control target key end

     0   :  { %8 = vsyncpa [#allocation3], 0  ;;  %s1456_s0 = inlined_call_operand.vmem [shape: bf16[2,3,4,4,9,5], index: 0, kind: input, shape index: {}]   ;;  %s1457_s1 = inlined_call_operand.vmem [shape: bf16[9,5,128], index: 1, kind: input, shape index: {}]   ;;  %s1458_s2 = inlined_call_operand.vmem [shape: f32[3,128], index: 2, kind: input, shape index: {}]   ;;  %s1459_s3 = inlined_call_operand.hbm [shape: bf16[2,3,24,128], index: 3, kind: output, shape index: {}]  }
   0x1   :  { %10 = vsyncpa [#allocation3 + $0x1], 0  ;;  %s1216_s12 = smov 0   ;;  %s1218_s13 = smov 0  }
   0x2   :  { %s1220_s14 = smov 0   ;;  %s1222_s15 = smov 0  }
   0x3   :  { %s1224_s16 = smov 0   ;;  %s1226_s17 = smov 0  }
   0x4   :  { %s1228_s18 = smov 0   ;;  %s1230_s19 = smov 0  }
   0x5 LB: > { %s906_s20 = sadd.s32 4294967295, %s1190_s19   ;;  %s907_s21 = sadd.s32 4294967294, %s1190_s19   ;;  %s1190_s19 = sphi %s1230_s19, %s16_s19   ;;  %s1186_s18 = sphi %s1228_s18, %s1470_s18   ;;  %s1182_s17 = sphi %s1226_s17, %s1469_s17   ;;  %s1178_s16 = sphi %s1224_s16, %s1468_s16   ;;  %s1174_s15 = sphi %s1222_s15, %s1467_s15   ;;  %s1170_s14 = sphi %s1220_s14, %s1466_s14   ;;  %s1166_s13 = sphi %s1218_s13, %s1465_s13   ;;  %s1162_s12 = sphi %s1216_s12, %s1464_s12  }
   0x6   : > { %s25_s22 = sadd.s32 1, %s1182_s17  ;;  %s28_s23 = sadd.s32 1, %s1186_s18 }
   0x7   : > { %p26_p0 = scmp.ge.s32.totalorder %s25_s22, 3  ;;  %p117_p1 = scmp.ne.s32.totalorder %s1170_s14, %s1166_s13 }
   0x8   : > { %p118_p2 = scmp.eq.s32.totalorder %s906_s20, 5  ;;  %p123_p5 = scmp.ne.s32.totalorder %s1166_s13, %s1162_s12 }
   0x9   : > { %s1472_s22 = smov (%p26_p0, %s25_s22), 0  ;;  %s1474_s23 = smov (!%p26_p0, %s28_s23), %s1186_s18 }
   0xa   : > { %s103_s24 = ssub.s32 %s1182_s17, %s1472_s22  ;;  %p1267_p3 = por %p118_p2, %p117_p1 }
   0xb   : > { %p30_p4 = scmp.ge.s32.totalorder %s1474_s23, 2  ;;  %p124_p6 = scmp.eq.s32.totalorder %s907_s21, 5 }
   0xc   : > { %p910_p7 = scmp.ge.s32.totalorder %s1190_s19, 1  ;;  %p160_p9 = scmp.lt.s32.totalorder %s1190_s19, 7 }
   0xd   : > { %s1476_s23 = smov (%p30_p4, %s1474_s23), 0  ;;  %p1276_p8 = por %p124_p6, %p123_p5 }
   0xe   : > { %s102_s27 = ssub.s32 %s1186_s18, %s1476_s23  ;;  %s107_s28 = sadd.s32 1, %s1170_s14 }
   0xf   : > { %s104_s29 = sor.u32 %s103_s24, %s102_s27  ;;  %p161_p10 = pnand %p910_p7, %p160_p9 }
  0x10   : > { %p105_p11 = scmp.eq.s32.totalorder %s104_s29, 0  ;;  %p188_p12 = scmp.lt.s32.totalorder (!%p161_p10), %s1178_s16, 1 }
  0x11   : > { %164 = sbr.rel (%p161_p10) target bundleno = 383 (0x17f), region = 32  ;;  %p190_p13 = scmp.lt.s32.totalorder (!%p161_p10), %s1174_s15, 2 }
  0x12   : > { %s1285_s30 = scalar_select %p105_p11, %s1170_s14, %s107_s28  }
  0x13   : > { %s1007_s7 = smul.u32 (!%p161_p10), 3, %s1174_s15  ;;  %s1116_s11 = scalar_lea.hbm (!%p161_p10), %s1459_s3, 72 }
  0x16   : > { %v916_v0 = vld [vmem:[%s1457_s1 + $0x4] sm:$0x7]  ;;  %vm223_vm0 = vcmask 1041408   ;;  %vm224_vm1 = vcmask 1042432   ;;  %v1192_v1 = vmov 65535   ;;  %s189_s8 = scalar_select %p188_p12, %s1178_s16, 1 }
  0x17   : > { %v225_v2 = vsel %vm223_vm0, 4294967295, %v1192_v1  ;;  %v201_v3 = vld [vmem:[%s1457_s1] sm:$0x7]  ;;  %v935_v5 = vld [vmem:[%s1457_s1 + $0xc] sm:$0x7]  ;;  %s191_s21 = scalar_select %p190_p13, %s1174_s15, 2 }
  0x18   : > { %v226_v4 = vsel %vm224_vm1, %v225_v2, 0  ;;  %v929_v6 = vld [vmem:[%s1457_s1 + $0x8] sm:$0x7]  ;;  %v945_v11 = vld [vmem:[%s1457_s1 + $0x10] sm:$0x7]  ;;  %s1006_s4 = smul.u32 96, %s189_s8 }
  0x19   : > { %v228_v7 = vand.u32 %v916_v0, %v226_v4  ;;  %v263_v8 = vand.u32 %v226_v4, %v201_v3  ;;  %v392_v9 = vand.u32 %v935_v5, %v226_v4  ;;  %v348_v10 = vand.u32 %v929_v6, %v226_v4  ;;  %v964_v12 = vld [vmem:[%s1457_s1 + $0x18] sm:$0x7]  ;;  %s911_s5 = sshll.u32 %s191_s21, 5  ;;  %v974_v15 = vld [vmem:[%s1457_s1 + $0x1c] sm:$0x7] }
  0x1a   : > { %v436_v13 = vand.u32 %v945_v11, %v226_v4  ;;  %v565_v14 = vand.u32 %v964_v12, %v226_v4  ;;  %s194_s9 = sadd.s32 %s1006_s4, %s911_s5  ;;  %v609_v16 = vand.u32 %v974_v15, %v226_v4  ;;  %v987_v17 = vld [vmem:[%s1457_s1 + $0x20] sm:$0x7]  ;;  %vm216_vm2 = vcmask 39936   ;;  %v958_v18 = vld [vmem:[%s1457_s1 + $0x14] sm:$0x7] }
  0x1b   : > { %237 = vmatpush.bf16.msra.mxu0 %v228_v7  ;;  %1004 = vmatpush.bf16.msra.mxu1 %v228_v7  ;;  %s912_s20 = sshll.u32 %s194_s9, 2  ;;  %v694_v22 = vand.u32 %v987_v17, %v226_v4  ;;  %v521_v32 = vand.u32 %v958_v18, %v226_v4  ;;  %vm289_vm3 = vsmask.f32 3328  ;;  %vm290_vm4 = vsmask.f32 7440  ;;  %s1008_s9 = smul.u32 9, %s1178_s16 }
  0x1c   : > { %401 = vmatpush.bf16.msra.mxu3 %v392_v9  ;;  %357 = vmatpush.bf16.msra.mxu2 %v348_v10  ;;  %s1318_s27 = scalar_lea.vmem %s1456_s0, %s912_s20  ;;  %vm1336_vm5 = vmor %vm289_vm3, %vm290_vm4  ;;  %s185_s20 = sand.u32 1, %s1166_s13  }
  0x1d   : > { %v919_v19 = vld [vmem:[%s1318_s27 + $0x20] sm:$0xf]  ;;  %v994_v20 = vld [vmem:[%s1318_s27 + $0x24] sm:$0xf0]  ;;  %v915_v21 = vld [vmem:[%s1318_s27 + $0x30] sm:$0xf]  ;;  %s815_s8 = sadd.s32 %s1008_s9, %s1007_s7 }
  0x1e   : > { %v920_v23 = vor.u32 %v994_v20, %v919_v19  ;;  %v213_v24 = vunpack.c.l.b16 %v915_v21  ;;  %v938_v25 = vld [vmem:[%s1318_s27 + $0x40] sm:$0xf]  ;;  %v995_v26 = vld [vmem:[%s1318_s27 + $0x44] sm:$0xf0]  ;;  %v284_v29 = vld [vmem:[%s1318_s27 + $0x4] sm:$0x1] }
  0x1f   : > { %272 = vmatpush.bf16.msrb.mxu1 %v263_v8  ;;  %445 = vmatpush.bf16.msrb.mxu0 %v436_v13  ;;  %v283_v27 = vld [vmem:[%s1318_s27] sm:$0xf]  ;;  %v939_v28 = vor.u32 %v995_v26, %v938_v25  ;;  %v285_v30 = vld [vmem:[%s1318_s27 + $0x8] sm:$0xf]  ;;  %v286_v31 = vld [vmem:[%s1318_s27 + $0xc] sm:$0x1] }
  0x20   : > { %574 = vmatpush.bf16.msrb.mxu2 %v565_v14  ;;  %618 = vmatpush.bf16.msrb.mxu3 %v609_v16  ;;  %v215_v33 = vpack.c.b16 %v213_v24, %v213_v24  ;;  %v293_v34 = vshrl.u32 %v283_v27, 16  ;;  %v296_v35 = vshll.u32 %v283_v27, 16  ;;  %v302_v36 = vshll.u32 %v284_v29, 16  ;;  %v287_v46 = vld [vmem:[%s1318_s27 + $0x10] sm:$0xf]  ;;  %s1005_s15 = smul.u32 12, %s185_s20 }
  0x21   : > { %921 = vmatmul.msk.bf16.vlgmr.msra.gmra.mxu0 %vm216_vm2, %v920_v23  ;;  %940 = vmatmul.msk.bf16.vlgmr.msra.gmra.mxu3 %vm216_vm2, %v939_v28  ;;  %v307_v37 = vshrl.u32 %v285_v30, 16  ;;  %v310_v38 = vshll.u32 %v285_v30, 16  ;;  %v316_v39 = vshll.u32 %v286_v31, 16  ;;  %v321_v50 = vshrl.u32 %v287_v46, 16  ;;  %v934_v53 = vld [vmem:[%s1318_s27 + $0x50] sm:$0xf] }
  0x22   : > { %922 = vmatmul.msk.bf16.vlgmr.msra.gmra.mxu1 %vm216_vm2, %v215_v33  ;;  %v295_v40 = vrot.slane %v293_v34, 4  ;;  %v298_v41 = vrot.slane %v296_v35, 5  ;;  %v304_v45 = vrot.slane %v302_v36, 5  ;;  %v324_v51 = vshll.u32 %v287_v46, 16  ;;  %v288_v58 = vld [vmem:[%s1318_s27 + $0x14] sm:$0x1] }
  0x23   : > { %703 = vmatpush.bf16.msra.mxu0 %v694_v22  ;;  %v309_v42 = vrot.slane %v307_v37, 4  ;;  %v312_v43 = vrot.slane %v310_v38, 5  ;;  %530 = vmatpush.bf16.msra.mxu1 %v521_v32  ;;  %v318_v49 = vrot.slane %v316_v39, 5  ;;  %v323_v55 = vrot.slane %v321_v50, 4  ;;  %v948_v61 = vld [vmem:[%s1318_s27 + $0x60] sm:$0xf] }
  0x24   : > { %v299_v44 = vor.u32 %v298_v41, %v295_v40  ;;  %v326_v56 = vrot.slane %v324_v51, 5  ;;  %v996_v62 = vld [vmem:[%s1318_s27 + $0x64] sm:$0xf0]  ;;  %v382_v63 = vunpack.c.l.b16 %v934_v53  ;;  %v925_v1 = vld [vmem:[%s1318_s27] sm:$0xf]  ;;  %v330_v4 = vshll.u32 %v288_v58, 16 }
  0x25   : > { %v313_v48 = vor.u32 %v312_v43, %v309_v42  ;;  %v993_v2 = vld [vmem:[%s1318_s27 + $0x4] sm:$0xf0]  ;;  %v949_v6 = vor.u32 %v996_v62, %v948_v61  ;;  %v983_v12 = vld [vmem:[%s1318_s27 + $0x10] sm:$0xf]  ;;  %v952_v14 = vld [vmem:[%s1318_s27 + $0x40] sm:$0xf] }
  0x26   : > { %v300_v52 = vrot.slane %v299_v44, 4  ;;  %v327_v3 = vor.u32 %v326_v56, %v323_v55  ;;  %v384_v7 = vpack.c.b16 %v382_v63, %v382_v63  ;;  %v926_v8 = vor.u32 %v993_v2, %v925_v1  ;;  %v981_v11 = vld [vmem:[%s1318_s27 + $0x8] sm:$0xf]  ;;  %v944_v16 = vld [vmem:[%s1318_s27 + $0x70] sm:$0xf]  ;;  %s990_s16 = sshll.u32 %s815_s8, 2 }
  0x27   : > { %v314_v54 = vrot.slane %v313_v48, 4  ;;  %v332_v10 = vrot.slane %v330_v4, 5  ;;  %v954_v15 = vld [vmem:[%s1318_s27 + $0x48] sm:$0xf]  ;;  %v639_v17 = vshrl.u32 %v981_v11, 16  ;;  %v642_v18 = vshll.u32 %v981_v11, 16  ;;  %s817_s21 = scalar_lea.hbm %s1459_s3, %s990_s16 }
  0x28   : > { %v305_v57 = vsel %vm1336_vm5, %v300_v52, %v304_v45  ;;  %v328_v9 = vrot.slane %v327_v3, 4  ;;  %v653_v19 = vshrl.u32 %v983_v12, 16  ;;  %v656_v20 = vshll.u32 %v983_v12, 16  ;;  %v200_v22 = vld [vmem:[%s1318_s27 + $0x10] sm:$0xf]  ;;  %s187_s28 = scalar_lea.vmem [#allocation2], %s1005_s15 }
  0x29   : > { %v319_v59 = vsel %vm1336_vm5, %v314_v54, %v318_v49  ;;  %v336_v60 = vunpack.c.l.b16 %v305_v57  ;;  %v466_v23 = vshrl.u32 %v952_v14, 16  ;;  %v469_v24 = vshll.u32 %v952_v14, 16  ;;  %v977_v28 = vld [vmem:[%s1318_s27 + $0x28] sm:$0xf]  ;;  %v998_v29 = vld [vmem:[%s1318_s27 + $0x2c] sm:$0xf0] }
  0x2a   : > { %v337_v0 = vunpack.c.l.b16 %v319_v59  ;;  %v333_v13 = vsel %vm1336_vm5, %v328_v9, %v332_v10  ;;  %v480_v25 = vshrl.u32 %v954_v15, 16  ;;  %v483_v26 = vshll.u32 %v954_v15, 16  ;;  %v982_v36 = vld [vmem:[%s1318_s27 + $0xc] sm:$0x1]  ;;  %v984_v37 = vld [vmem:[%s1318_s27 + $0x14] sm:$0x1] }
  0x2b   : > { %v338_v21 = vunpack.c.l.b16 %v333_v13  ;;  %v426_v27 = vunpack.c.l.b16 %v944_v16  ;;  %v641_v30 = vrot.slane %v639_v17, 4  ;;  %v644_v31 = vrot.slane %v642_v18, 5  ;;  %v953_v44 = vld [vmem:[%s1318_s27 + $0x44] sm:$0x1]  ;;  %v955_v45 = vld [vmem:[%s1318_s27 + $0x4c] sm:$0x1] }
  0x2c   : > { %v339_v5 = vpack.c.b16 %v337_v0, %v336_v60  ;;  %v655_v32 = vrot.slane %v653_v19, 4  ;;  %v658_v33 = vrot.slane %v656_v20, 5  ;;  %v253_v35 = vunpack.c.l.b16 %v200_v22  ;;  %v985_v60 = vld [vmem:[%s1318_s27 + $0x18] sm:$0xf]  ;;  %v956_v1 = vld [vmem:[%s1318_s27 + $0x50] sm:$0xf] }
  0x2d   : > { %v340_v34 = vpack.c.b16 %v338_v21, %v338_v21  ;;  %v468_v38 = vrot.slane %v466_v23, 4  ;;  %v471_v39 = vrot.slane %v469_v24, 5  ;;  %v482_v40 = vrot.slane %v480_v25, 4  ;;  %v986_v21 = vld [vmem:[%s1318_s27 + $0x1c] sm:$0x1]  ;;  %s818_s29 = sshll.u32 %s187_s28, 4  ;;  %s819_s29 = int_to_ptr.vmem [resolvable:$true] %s818_s29 }
  0x2e   : > { %930 = vmatmul.msk.bf16.vlgmr.msra.gmra.mxu2 %vm216_vm2, %v339_v5  ;;  %v485_v41 = vrot.slane %v483_v26, 5  ;;  %v428_v42 = vpack.c.b16 %v426_v27, %v426_v27  ;;  %v978_v43 = vor.u32 %v998_v29, %v977_v28  ;;  %v645_v46 = vor.u32 %v644_v31, %v641_v30  ;;  %v957_v25 = vld [vmem:[%s1318_s27 + $0x54] sm:$0x1]  ;;  %s820_s4 = sshll.u32 %s817_s21, 4  ;;  %s804_s5 = scalar_lea.sflag [#allocation3], %s185_s20  ;;  %s821_s4 = int_to_ptr.hbm [resolvable:$true] %s820_s4 }
  0x2f   : > { %v648_v48 = vshll.u32 %v982_v36, 16  ;;  %v659_v49 = vor.u32 %v658_v33, %v655_v32  ;;  %v662_v50 = vshll.u32 %v984_v37, 16  ;;  %v255_v51 = vpack.c.b16 %v253_v35, %v253_v35  ;;  %s1110_s6 = sshra.s32 %s821_s4, 4  ;;  %s1111_s6 = int_to_ptr.hbm [resolvable:$true] %s1110_s6 }
  0x30   : > { %v472_v52 = vor.u32 %v471_v39, %v468_v38  ;;  %v475_v53 = vshll.u32 %v953_v44, 16  ;;  %v486_v54 = vor.u32 %v485_v41, %v482_v40  ;;  %v489_v55 = vshll.u32 %v955_v45, 16  ;;  %s1112_s7 = scalar_lea.hbm %s1111_s6, 12  ;;  %p1117_p4 = scmp.lt.s32.totalorder %s1111_s6, %s1459_s3 }
  0x31   : > { %950 = vmatmul.msk.bf16.vlgmr.msrb.gmra.mxu0 %vm216_vm2, %v949_v6  ;;  %941 = vmatmul.msk.bf16.gmra.mxu3 %vm216_vm2, %v384_v7  ;;  %v646_v56 = vrot.slane %v645_v46, 4  ;;  %v650_v57 = vrot.slane %v648_v48, 5  ;;  %v660_v58 = vrot.slane %v659_v49, 4  ;;  %v664_v59 = vrot.slane %v662_v50, 5  ;;  %v973_v6 = vld [vmem:[%s1318_s27 + $0x38] sm:$0xf]  ;;  %p1113_p0 = scmp.ne.s32.totalorder %s1111_s6, %s1112_s7  ;;  %p1118_p5 = scmp.lt.s32.totalorder %s1116_s11, %s1112_s7 }
  0x32   : > { %927 = vmatmul.msk.bf16.vlgmr.msrb.gmra.mxu1 %vm216_vm2, %v926_v8  ;;  %v473_v61 = vrot.slane %v472_v52, 4  ;;  %v477_v62 = vrot.slane %v475_v53, 5  ;;  %v487_v63 = vrot.slane %v486_v54, 4  ;;  %v491_v0 = vrot.slane %v489_v55, 5  ;;  %v967_v7 = vld [vmem:[%s1318_s27 + $0x8] sm:$0xf] }
  0x33   : > { %v651_v2 = vsel %vm1336_vm5, %v646_v56, %v650_v57  ;;  %v665_v3 = vsel %vm1336_vm5, %v660_v58, %v664_v59  ;;  %v667_v4 = vshrl.u32 %v985_v60, 16  ;;  %v670_v5 = vshll.u32 %v985_v60, 16  ;;  %v997_v8 = vld [vmem:[%s1318_s27 + $0xc] sm:$0xf0]  ;;  %p1114_p1 = pnand %p1113_p0, %p1267_p3  ;;  %p1119_p6 = por %p1118_p5, %p1117_p4 }
  0x34   : > { %v478_v9 = vsel %vm1336_vm5, %v473_v61, %v477_v62  ;;  %v492_v10 = vsel %vm1336_vm5, %v487_v63, %v491_v0  ;;  %v494_v11 = vshrl.u32 %v956_v1, 16  ;;  %v497_v12 = vshll.u32 %v956_v1, 16 }
  0x35   : > { %v682_v13 = vunpack.c.l.b16 %v651_v2  ;;  %v683_v14 = vunpack.c.l.b16 %v665_v3  ;;  %v599_v15 = vunpack.c.l.b16 %v973_v6  ;;  %v669_v16 = vrot.slane %v667_v4, 4  ;;  %p1115_p2 = pneg %p1114_p1 }
  0x36   : > { %v672_v17 = vrot.slane %v670_v5, 5  ;;  %v968_v18 = vor.u32 %v997_v8, %v967_v7  ;;  %v509_v19 = vunpack.c.l.b16 %v478_v9  ;;  %v510_v20 = vunpack.c.l.b16 %v492_v10 }
  0x37   : > { %v496_v22 = vrot.slane %v494_v11, 4  ;;  %v499_v23 = vrot.slane %v497_v12, 5  ;;  %v685_v24 = vpack.c.b16 %v683_v14, %v682_v13  ;;  %v601_v26 = vpack.c.b16 %v599_v15, %v599_v15  ;;  %p1120_p7 = pnand %p1119_p6, %p1115_p2 }
  0x38   : > { %v673_v27 = vor.u32 %v672_v17, %v669_v16  ;;  %v676_v28 = vshll.u32 %v986_v21, 16  ;;  %v512_v29 = vpack.c.b16 %v510_v20, %v509_v19  ;;  %v503_v31 = vshll.u32 %v957_v25, 16 }
  0x39   : > { %v500_v30 = vor.u32 %v499_v23, %v496_v22  ;;  %v1193_v2 = vmov 8  }
  0x3a   : > { %v674_v32 = vrot.slane %v673_v27, 4  ;;  %v678_v33 = vrot.slane %v676_v28, 5  ;;  %v505_v36 = vrot.slane %v503_v31, 5  ;;  %1086 = vset.pattern.permute.xlu2 %v1193_v2  ;;  %1084 = vset.pattern.permute.xlu0 %v1193_v2 }
  0x3b   : > { %v501_v35 = vrot.slane %v500_v30, 4  ;;  %1085 = vset.pattern.permute.xlu1 %v1193_v2 }
  0x3c   : > { %v679_v37 = vsel %vm1336_vm5, %v674_v32, %v678_v33 }
  0x3d   : > { %v506_v39 = vsel %vm1336_vm5, %v501_v35, %v505_v36  ;;  %v684_v40 = vunpack.c.l.b16 %v679_v37 }
  0x3e   : > { %931 = vmatmul.msk.bf16.gmra.mxu2 %vm216_vm2, %v340_v34  ;;  %v963_v34 = vld [vmem:[%s1318_s27 + $0x18] sm:$0xf] }
  0x3f   : > { %v555_v38 = vunpack.c.l.b16 %v963_v34 }
  0x41   : > { %951 = vmatmul.msk.bf16.gmra.mxu0 %vm216_vm2, %v428_v42  ;;  %979 = vmatmul.msk.bf16.vlgmr.msrb.gmra.mxu3 %vm216_vm2, %v978_v43  ;;  %v557_v41 = vpack.c.b16 %v555_v38, %v555_v38  ;;  %v511_v42 = vunpack.c.l.b16 %v506_v39  ;;  %v686_v43 = vpack.c.b16 %v684_v40, %v684_v40 }
  0x42   : > { %928 = vmatmul.msk.bf16.gmra.mxu1 %vm216_vm2, %v255_v51 }
  0x43   : > { %v513_v44 = vpack.c.b16 %v511_v42, %v511_v42 }
  0x4e   : > { %969 = vmatmul.msk.bf16.vlgmr.msrb.gmra.mxu2 %vm216_vm2, %v968_v18 }
  0x51   : > { %988 = vmatmul.msk.bf16.vlgmr.msra.gmra.mxu0 %vm216_vm2, %v685_v24  ;;  %980 = vmatmul.msk.bf16.gmra.mxu3 %vm216_vm2, %v601_v26 }
  0x52   : > { %959 = vmatmul.msk.bf16.vlgmr.msra.gmra.mxu1 %vm216_vm2, %v512_v29 }
  0x5e   : > { %970 = vmatmul.msk.bf16.gmra.mxu2 %vm216_vm2, %v557_v41 }
  0x61   : > { %989 = vmatmul.msk.bf16.gmra.mxu0 %vm216_vm2, %v686_v43 }
  0x62   : > { %960 = vmatmul.msk.bf16.gmra.mxu1 %vm216_vm2, %v513_v44 }
  0x9e   : > { %v239_v45 = vpop.f32.mrf.mxu0 }
  0x9f   : > { %v244_v46 = vpop.f32.mrf.mxu1 }
  0xa4   : > { %v403_v48 = vpop.f32.mrf.mxu3 }
  0xa6   : > { %v241_v49 = vpop.f32.mrf.mxu0 }
  0xa7   : > { %v246_v50 = vpop.f32.mrf.mxu1 }
  0xac   : > { %v405_v51 = vpop.f32.mrf.mxu3 }
  0xae   : > { %v447_v52 = vpop.f32.mrf.mxu0 }
  0xaf   : > { %v274_v47 = vpop.f32.mrf.mxu1 }
  0xb0   : > { %v275_v62 = vadd.f32 %v274_v47, %v239_v45 }
  0xb1   : > { %v359_v53 = vpop.f32.mrf.mxu2 }
  0xb2   : > { %v368_v1 = vadd.f32 %v359_v53, %v275_v62 }
  0xb4   : > { %v408_v54 = vpop.f32.mrf.mxu3  ;;  %v412_v6 = vadd.f32 %v403_v48, %v368_v1 }
  0xb6   : > { %v449_v55 = vpop.f32.mrf.mxu0  ;;  %v456_v10 = vadd.f32 %v447_v52, %v412_v6 }
  0xb7   : > { %v276_v56 = vpop.f32.mrf.mxu1 }
  0xb8   : > { %v277_v5 = vadd.f32 %v276_v56, %v241_v49 }
  0xb9   : > { %v361_v57 = vpop.f32.mrf.mxu2 }
  0xba   : > { %v369_v9 = vadd.f32 %v361_v57, %v277_v5 }
  0xbc   : > { %v410_v58 = vpop.f32.mrf.mxu3  ;;  %v413_v16 = vadd.f32 %v405_v51, %v369_v9  ;;  %v789_v9 = vlaneseq }
  0xbe   : > { %v452_v59 = vpop.f32.mrf.mxu0  ;;  %v457_v22 = vadd.f32 %v449_v55, %v413_v16 }
  0xbf   : > { %v279_v60 = vpop.f32.mrf.mxu1 }
  0xc0   : > { %v280_v14 = vadd.f32 %v279_v60, %v244_v46 }
  0xc1   : > { %v364_v61 = vpop.f32.mrf.mxu2 }
  0xc2   : > { %v370_v20 = vadd.f32 %v364_v61, %v280_v14 }
  0xc4   : > { %v620_v63 = vpop.f32.mrf.mxu3  ;;  %v414_v28 = vadd.f32 %v408_v54, %v370_v20 }
  0xc6   : > { %v454_v0 = vpop.f32.mrf.mxu0  ;;  %v458_v33 = vadd.f32 %v452_v59, %v414_v28 }
  0xc7   : > { %v281_v3 = vpop.f32.mrf.mxu1  ;;  %v1087_v0 = vld [vmem:[%s1458_s2] ss:$0 sm:$0xff] }
  0xc8   : > { %v1088_v3 = vld [vmem:[%s1458_s2 + $0x1] ss:$0 sm:$0xff] }
  0xc9   : > { %v366_v4 = vpop.f32.mrf.mxu2 }
  0xcc   : > { %v622_v7 = vpop.f32.mrf.mxu3 }
  0xce   : > { %v705_v8 = vpop.f32.mrf.mxu0 }
  0xcf   : > { %v532_v11 = vpop.f32.mrf.mxu1 }
  0xd0   : > { %v541_v12 = vadd.f32 %v532_v11, %v456_v10  ;;  %v1089_v10 = vld [vmem:[%s1458_s2 + $0x2] ss:$0 sm:$0xff] }
  0xd1   : > { %v576_v13 = vpop.f32.mrf.mxu2 }
  0xd2   : > { %v585_v15 = vadd.f32 %v576_v13, %v541_v12 }
  0xd4   : > { %v629_v17 = vadd.f32 %v620_v63, %v585_v15  ;;  %v625_v18 = vpop.f32.mrf.mxu3  ;;  %v790_v15 = vand.u32 127, %v789_v9 }
  0xd6   : > { %v707_v19 = vpop.f32.mrf.mxu0  ;;  %v714_v21 = vadd.f32 %v705_v8, %v629_v17  ;;  %vm791_vm6 = vcmp.eq.s32.totalorder %v790_v15, 8 }
  0xd7   : > { %v534_v23 = vpop.f32.mrf.mxu1 }
  0xd8   : > { %v542_v24 = vadd.f32 %v534_v23, %v457_v22  ;;  %v723_v25 = vadd.f32 1e-08, %v714_v21  ;;  %v717_v32 = vmax.f32 %v714_v21, 0.0 }
  0xd9   : > { %v578_v26 = vpop.f32.mrf.mxu2 }
  0xda   : > { %v586_v27 = vadd.f32 %v578_v26, %v542_v24  ;;  %1090 = vrcp.f32 %v723_v25  ;;  %v720_v41 = vmin.f32 %v717_v32, 1.0 }
  0xdc   : > { %v630_v29 = vadd.f32 %v622_v7, %v586_v27  ;;  %v627_v30 = vpop.f32.mrf.mxu3 }
  0xde   : > { %v710_v31 = vpop.f32.mrf.mxu0  ;;  %v715_v34 = vadd.f32 %v707_v19, %v630_v29 }
  0xdf   : > { %v537_v35 = vpop.f32.mrf.mxu1 }
  0xe0   : > { %v1091_v36 = vpop.eup %1090  ;;  %v543_v37 = vadd.f32 %v537_v35, %v458_v33  ;;  %v718_v38 = vmax.f32 %v715_v34, 0.0  ;;  %v724_v39 = vadd.f32 1e-08, %v715_v34 }
  0xe1   : > { %v581_v40 = vpop.f32.mrf.mxu2  ;;  %v729_v42 = vmul.f32 9.0, %v1091_v36 }
  0xe2   : > { %v587_v43 = vadd.f32 %v581_v40, %v543_v37  ;;  %v721_v44 = vmin.f32 %v718_v38, 1.0  ;;  %1092 = vrcp.f32 %v724_v39 }
  0xe3   : > { %v732_v45 = vmul.f32 %v729_v42, %v720_v41 }
  0xe4   : > { %v631_v46 = vadd.f32 %v625_v18, %v587_v43  ;;  %767 = vperm.xlu2 %1086, %v721_v44  }
  0xe5   : > { %740 = vperm.xlu0 %1084, %v732_v45  }
  0xe6   : > { %v712_v48 = vpop.f32.mrf.mxu0  ;;  %v716_v49 = vadd.f32 %v710_v31, %v631_v46 }
  0xe7   : > { %v539_v50 = vpop.f32.mrf.mxu1 }
  0xe8   : > { %v1093_v51 = vpop.eup %1092  ;;  %v719_v52 = vmax.f32 %v716_v49, 0.0  ;;  %v725_v47 = vadd.f32 1e-08, %v716_v49 }
  0xe9   : > { %v730_v53 = vmul.f32 9.0, %v1093_v51  ;;  %v583_v54 = vpop.f32.mrf.mxu2 }
  0xea   : > { %v722_v55 = vmin.f32 %v719_v52, 1.0  ;;  %1094 = vrcp.f32 %v725_v47 }
  0xeb   : > { %v733_v56 = vmul.f32 %v730_v53, %v721_v44 }
  0xec   : > { %772 = vperm.xlu2 %1086, %v722_v55  }
  0xed   : > { %745 = vperm.xlu0 %1084, %v733_v56  }
  0xf0   : > { %v1095_v57 = vpop.eup %1094 }
  0xf1   : > { %v731_v58 = vmul.f32 9.0, %v1095_v57 }
  0xf3   : > { %v734_v59 = vmul.f32 %v731_v58, %v722_v55 }
  0xf5   : > { %750 = vperm.xlu1 %1085, %v734_v59  }
  0xfd   : > { %762 = vperm.xlu1 %1085, %v720_v41  }
 0x13e   : > { %v768_v63 = vpop.permute.xlu2 %767 }
 0x146   : > { %v773_v8 = vpop.permute.xlu2 %772 }
 0x157   : > { %v741_v60 = vpop.permute.xlu0 %740 }
 0x158   : > { %v753_v6 = vmul.f32 %v741_v60, %v714_v21 }
 0x15a   : > { %v757_v14 = vadd.f32 %v1087_v0, %v753_v6 }
 0x15f   : > { %v746_v61 = vpop.permute.xlu0 %745 }
 0x160   : > { %v754_v62 = vmul.f32 %v746_v61, %v715_v34 }
 0x162   : > { %v758_v1 = vadd.f32 %v1087_v0, %v754_v62 }
 0x164   : > { %v776_v4 = vmul.f32 %v768_v63, %v758_v1 }
 0x166   : > { %v780_v11 = vmul.f32 %v1088_v3, %v776_v4 }
 0x167   : > { %v751_v2 = vpop.permute.xlu1 %750 }
 0x168   : > { %v755_v5 = vmul.f32 %v751_v2, %v716_v49  ;;  %v784_v17 = vadd.f32 %v1089_v10, %v780_v11 }
 0x16a   : > { %v759_v7 = vadd.f32 %v1087_v0, %v755_v5  ;;  %v787_v24 = vmax.f32 %v784_v17, 0.0 }
 0x16c   : > { %v777_v12 = vmul.f32 %v773_v8, %v759_v7  ;;  %v795_v28 = vsel %vm791_vm6, %v768_v63, %v787_v24 }
 0x16e   : > { %v781_v13 = vmul.f32 %v1088_v3, %v777_v12 }
 0x16f   : > { %v763_v16 = vpop.permute.xlu1 %762 }
 0x170   : > { %v785_v18 = vadd.f32 %v1089_v10, %v781_v13  ;;  %v775_v19 = vmul.f32 %v763_v16, %v757_v14 }
 0x172   : > { %v788_v20 = vmax.f32 %v785_v18, 0.0  ;;  %v779_v21 = vmul.f32 %v1088_v3, %v775_v19 }
 0x174   : > { %v796_v22 = vsel %vm791_vm6, %v773_v8, %v788_v20  ;;  %v783_v23 = vadd.f32 %v1089_v10, %v779_v21 }
 0x175   : > { %v799_v25 = vpack.c.bf16 %v796_v22, %v796_v22 }
 0x176   : > { %v786_v26 = vmax.f32 %v783_v23, 0.0 }
 0x177   : > { %802 = vst [vmem:[%s187_s28 + $0x8] sm:$0xf] %v799_v25 }
 0x178   : > { %v794_v27 = vsel %vm791_vm6, %v763_v16, %v786_v26 }
 0x179   : > { %v1002_v29 = vpack.c.bf16 %v795_v28, %v794_v27 }
 0x17b   : > { %1003 = vst [vmem:[%s187_s28] sm:$0xff] %v1002_v29  }
 0x17c   : > { %1123 = shalt.err (!%p1120_p7)
}
 0x17d   : > { %s1194_s20 = smov 64   ;;  %s1195_s16 = smov 4  }
 0x17e   : > { %1009 = dma.vmem_to_hbm [thread:$0]  (%p1267_p3), %s819_s29, 192, %s821_s4, %s804_s5, %s1194_s20, %s1194_s20, %s1195_s16  }
 0x17f PF: > { %p1015_p9 = scmp.ge.s32.totalorder %s1190_s19, 2  ;;  %s835_s24 = sand.u32 1, %s1162_s12  }
 0x180   : > { %s836_s27 = scalar_lea.sflag [#allocation3], %s835_s24 }
 0x181   : > { %p1012_p10 = pnand %p1015_p9, %p1276_p8 }
 0x183   : > { %p1013_p11 = pneg %p1012_p10 }
 0x185   : > { %1157 = dma.done.wait (%p1013_p11), %s836_s27, 192  }
 0x186   : > { %1159 = vsyncadd (%p1013_p11), %s836_s27, 4294967104  ;;  %s16_s19 = sadd.s32 1, %s1190_s19   ;;  %s1464_s12 = smov %s1166_s13 }
 0x187   : > { %p13_p12 = scmp.ge.s32.totalorder %s16_s19, 8   ;;  %s1465_s13 = smov %s1170_s14 }
 0x188   : > { %s1466_s14 = smov %s1285_s30  ;;  %s1467_s15 = smov %s1182_s17 }
 0x189   : > { %s1468_s16 = smov %s1186_s18  ;;  %s1469_s17 = smov %s1472_s22 }
 0x18a   : > { %s1470_s18 = smov %s1476_s23  ;;  %15 = sbr.rel (!%p13_p12) target bundleno = 5 (0x5), region = 80 }
 0x18f   :  { %842 = vsyncpa [#allocation3], 1 }
 0x190   :  { %844 = vsyncpa [#allocation3 + $0x1], 1 }

</bundles_post_ra>
